<compile_context>
chip_gen: v5e
topology: v5e:2x2
jax: 0.10.0
libtpu: 0.0.40
codegen_flags: <defaults>
</compile_context>

<pallas_src>
import math
import functools

import jax
import jax.numpy as jnp
from jax.experimental import pallas as pl
from jax.experimental.pallas import tpu as pltpu


def causal_attention_kernel(x_ref, wq_ref, wk_ref, wv_ref,
                            bq_ref, bk_ref, bv_ref,
                            wp_ref, bp_ref, o_ref, *, n_head, bg, seq):
    """One batch-group per grid step.

    x_ref : (Bg*T, C) f32      wq/wk/wv_ref : (H, C, hd) bf16
    bq/bk/bv_ref : (H, 1, hd) f32
    wp_ref : (H, hd, C) bf16   bp_ref : (1, C) f32
    o_ref  : (Bg*T, C) f32
    """
    M, C = x_ref.shape
    hd = C // n_head
    scale = 1.0 / math.sqrt(hd)

    x_bf = x_ref[...].astype(jnp.bfloat16)                    # cast once for the MXU

    # Causal mask, hoisted out of the head loop (two (T,T) iotas + one compare).
    row = jax.lax.broadcasted_iota(jnp.int32, (seq, seq), 0)
    col = jax.lax.broadcasted_iota(jnp.int32, (seq, seq), 1)
    causal = (row >= col)[None, :, :]                          # (1, T, T)
    neg = jnp.float32(-1e30)                                   # finite, avoids NaN hazards

    y_acc = jnp.zeros((M, C), jnp.float32)
    for h in range(n_head):                                    # static, small
        # qkv projections over the batch-folded M dim (pure MXU, bf16 in / f32 acc).
        q = jnp.dot(x_bf, wq_ref[h], preferred_element_type=jnp.float32) + bq_ref[h]
        k = jnp.dot(x_bf, wk_ref[h], preferred_element_type=jnp.float32) + bk_ref[h]
        v = jnp.dot(x_bf, wv_ref[h], preferred_element_type=jnp.float32) + bv_ref[h]

        # Unfold batch for attention (tile-aligned reshape: T is a multiple of 8).
        q3 = q.reshape(bg, seq, hd).astype(jnp.bfloat16)       # (Bg, T, hd)
        k3 = k.reshape(bg, seq, hd).astype(jnp.bfloat16)
        v3 = v.reshape(bg, seq, hd).astype(jnp.bfloat16)

        s = jnp.einsum("btd,bsd->bts", q3, k3,
                       preferred_element_type=jnp.float32) * scale
        s = jnp.where(causal, s, neg)

        m = jnp.max(s, axis=-1, keepdims=True)
        p = jnp.exp(s - m)                                     # f32 elementwise (v5e-safe)
        l = jnp.sum(p, axis=-1, keepdims=True)

        o = jnp.einsum("bts,bsd->btd", p.astype(jnp.bfloat16), v3,
                       preferred_element_type=jnp.float32)     # (Bg, T, hd)
        o = o * pl.reciprocal(l, approx=True)                  # 1/l on the EUP slot

        # Fold the head-concat into the output projection: accumulate on the MXU.
        o2 = o.reshape(M, hd).astype(jnp.bfloat16)
        y_acc = y_acc + jnp.dot(o2, wp_ref[h], preferred_element_type=jnp.float32)

    y = y_acc + bp_ref[...]
    o_ref[...] = y.astype(o_ref.dtype)


def causal_attention(x, w_qkv, b_qkv, w_proj, b_proj, *, n_head):
    """x: (B, T, C) f32.  w_qkv: (C, 3C), b_qkv: (3C,), w_proj: (C, C), b_proj: (C,)."""
    B, T, C = x.shape
    assert C % n_head == 0
    H = n_head
    hd = C // H

    # Per-head weight re-layout, done once outside the kernel (free in XLA).
    def head_slab(w_part):                                     # (C, C) -> (H, C, hd)
        return jnp.transpose(w_part.reshape(C, H, hd), (1, 0, 2)).astype(jnp.bfloat16)

    w_q = head_slab(w_qkv[:, 0 * C:1 * C])
    w_k = head_slab(w_qkv[:, 1 * C:2 * C])
    w_v = head_slab(w_qkv[:, 2 * C:3 * C])
    b_q = b_qkv[0 * C:1 * C].reshape(H, 1, hd).astype(jnp.float32)
    b_k = b_qkv[1 * C:2 * C].reshape(H, 1, hd).astype(jnp.float32)
    b_v = b_qkv[2 * C:3 * C].reshape(H, 1, hd).astype(jnp.float32)
    w_p = w_proj.reshape(H, hd, C).astype(jnp.bfloat16)        # rows h*hd:(h+1)*hd per head
    b_p = b_proj.reshape(1, C).astype(jnp.float32)

    # Single grid step on v5e/v6e; 2 parallel steps (one per TensorCore) on v7x.
    n_groups = 2 if (B % 2 == 0 and B >= 2) else 1
    bg = B // n_groups
    if n_groups > 1 and (bg * T) % 8 != 0:
        n_groups, bg = 1, B                                    # keep sublane-tile alignment
    mb = bg * T

    x2 = x.reshape(B * T, C)                                   # fold batch into M (free)

    kernel = functools.partial(causal_attention_kernel, n_head=H, bg=bg, seq=T)

    out2 = pl.pallas_call(
        kernel,
        out_shape=jax.ShapeDtypeStruct((B * T, C), x.dtype),
        grid=(n_groups,),
        in_specs=[
            pl.BlockSpec((mb, C), lambda g: (g, 0)),           # x (batch-folded)
            pl.BlockSpec((H, C, hd), lambda g: (0, 0, 0)),     # w_q per head
            pl.BlockSpec((H, C, hd), lambda g: (0, 0, 0)),     # w_k per head
            pl.BlockSpec((H, C, hd), lambda g: (0, 0, 0)),     # w_v per head
            pl.BlockSpec((H, 1, hd), lambda g: (0, 0, 0)),     # b_q
            pl.BlockSpec((H, 1, hd), lambda g: (0, 0, 0)),     # b_k
            pl.BlockSpec((H, 1, hd), lambda g: (0, 0, 0)),     # b_v
            pl.BlockSpec((H, hd, C), lambda g: (0, 0, 0)),     # w_proj per head
            pl.BlockSpec((1, C), lambda g: (0, 0)),            # b_proj
        ],
        out_specs=pl.BlockSpec((mb, C), lambda g: (g, 0)),
        compiler_params=pltpu.CompilerParams(
            dimension_semantics=("parallel",)),
    )(x2, w_q, w_k, w_v, b_q, b_k, b_v, w_p, b_p)

    return out2.reshape(B, T, C)


def reference_attention(x, w_qkv, b_qkv, w_proj, b_proj, *, n_head):
    """Pure-JAX f32 reference mirroring the (fixed) PyTorch forward."""
    B, T, C = x.shape
    hd = C // n_head
    qkv = x @ w_qkv + b_qkv                                    # (B, T, 3C)
    q, k, v = jnp.split(qkv, 3, axis=-1)

    def split_heads(t):
        return t.reshape(B, T, n_head, hd).transpose(0, 2, 1, 3)   # (B, H, T, hd)

    q, k, v = split_heads(q), split_heads(k), split_heads(v)
    s = jnp.einsum("bhtd,bhsd->bhts", q, k) / math.sqrt(hd)
    mask = jnp.tril(jnp.ones((T, T), dtype=bool))
    s = jnp.where(mask, s, -jnp.inf)
    p = jax.nn.softmax(s, axis=-1)
    o = jnp.einsum("bhts,bhsd->bhtd", p, v)
    o = o.transpose(0, 2, 1, 3).reshape(B, T, C)
    return o @ w_proj + b_proj


if __name__ == "__main__":
    # ModelConfig defaults: batch_size=6, block_size=8, n_embd=12, n_head=2
    B, T, C, n_head = 6, 8, 12, 2

    key = jax.random.PRNGKey(0)
    kx, k1, k2, k3, k4 = jax.random.split(key, 5)

    x = jax.random.normal(kx, (B, T, C), dtype=jnp.float32)

    # Deterministic parameter init (PyTorch Linear-style uniform bounds).
    bound = 1.0 / math.sqrt(C)
    w_qkv = jax.random.uniform(k1, (C, 3 * C), jnp.float32, -bound, bound)
    b_qkv = jax.random.uniform(k2, (3 * C,), jnp.float32, -bound, bound)
    w_proj = jax.random.uniform(k3, (C, C), jnp.float32, -bound, bound)
    b_proj = jax.random.uniform(k4, (C,), jnp.float32, -bound, bound)

    out = causal_attention(x, w_qkv, b_qkv, w_proj, b_proj, n_head=n_head)
    out = jax.block_until_ready(out)

    ref = reference_attention(x, w_qkv, b_qkv, w_proj, b_proj, n_head=n_head)
    assert out.shape == (B, T, C)
    # bf16 MXU operands + approx reciprocal => bf16-appropriate tolerance vs f32 ref.
    max_err = float(jnp.max(jnp.abs(out - ref)))
    assert max_err < 5e-2, f"mismatch vs JAX reference: max_err={max_err}"

    print("KERNEL_OK")
</pallas_src>

<mosaic_0001>
module attributes {stable_mosaic.version = 11 : i64} {
  func.func @causal_attention_kernel(%arg0: i32, %arg1: memref<24x12xf32, #tpu.memory_space<vmem>>, %arg2: memref<2x12x6xbf16, #tpu.memory_space<vmem>>, %arg3: memref<2x12x6xbf16, #tpu.memory_space<vmem>>, %arg4: memref<2x12x6xbf16, #tpu.memory_space<vmem>>, %arg5: memref<2x1x6xf32, #tpu.memory_space<vmem>>, %arg6: memref<2x1x6xf32, #tpu.memory_space<vmem>>, %arg7: memref<2x1x6xf32, #tpu.memory_space<vmem>>, %arg8: memref<2x6x12xbf16, #tpu.memory_space<vmem>>, %arg9: memref<1x12xf32, #tpu.memory_space<vmem>>, %arg10: memref<24x12xf32, #tpu.memory_space<vmem>>) attributes {dimension_semantics = [#tpu.dimension_semantics<parallel>], iteration_bounds = array<i64: 2>, scalar_prefetch = 0 : i64, scratch_operands = 0 : i64, tpu.core_type = #tpu.core_type<tc>, window_params = [{transform_indices = @transform_0, window_bounds = array<i64: 24, 12>}, {pipeline_mode = #tpu.pipeline_mode<synchronous>, transform_indices = @transform_1, window_bounds = array<i64: 2, 12, 6>}, {pipeline_mode = #tpu.pipeline_mode<synchronous>, transform_indices = @transform_2, window_bounds = array<i64: 2, 12, 6>}, {pipeline_mode = #tpu.pipeline_mode<synchronous>, transform_indices = @transform_3, window_bounds = array<i64: 2, 12, 6>}, {pipeline_mode = #tpu.pipeline_mode<synchronous>, transform_indices = @transform_4, window_bounds = array<i64: 2, 1, 6>}, {pipeline_mode = #tpu.pipeline_mode<synchronous>, transform_indices = @transform_5, window_bounds = array<i64: 2, 1, 6>}, {pipeline_mode = #tpu.pipeline_mode<synchronous>, transform_indices = @transform_6, window_bounds = array<i64: 2, 1, 6>}, {pipeline_mode = #tpu.pipeline_mode<synchronous>, transform_indices = @transform_7, window_bounds = array<i64: 2, 6, 12>}, {pipeline_mode = #tpu.pipeline_mode<synchronous>, transform_indices = @transform_8, window_bounds = array<i64: 1, 12>}, {transform_indices = @transform_9, window_bounds = array<i64: 24, 12>}]} {
    %c0 = arith.constant 0 : index
    %c0_0 = arith.constant 0 : index
    %0 = vector.load %arg1[%c0, %c0_0] : memref<24x12xf32, #tpu.memory_space<vmem>>, vector<24x12xf32>
    %1 = arith.truncf %0 : vector<24x12xf32> to vector<24x12xbf16>
    %2 = tpu.iota {dimensions = array<i32: 0>} : vector<8x8xi32>
    %3 = tpu.iota {dimensions = array<i32: 1>} : vector<8x8xi32>
    %4 = arith.cmpi sge, %2, %3 : vector<8x8xi32>
    %5 = vector.shape_cast %4 : vector<8x8xi1> to vector<1x8x8xi1>
    %cst = arith.constant 0.000000e+00 : f32
    %6 = vector.broadcast %cst : f32 to vector<24x12xf32>
    %c0_1 = arith.constant 0 : index
    %c0_2 = arith.constant 0 : index
    %c0_3 = arith.constant 0 : index
    %7 = vector.load %arg2[%c0_1, %c0_2, %c0_3] : memref<2x12x6xbf16, #tpu.memory_space<vmem>>, vector<1x12x6xbf16>
    %8 = vector.shape_cast %7 : vector<1x12x6xbf16> to vector<12x6xbf16>
    %cst_4 = arith.constant dense<0.000000e+00> : vector<24x6xf32>
    %9 = tpu.matmul %1, %8, %cst_4 {dimension_numbers = #tpu.dot_dimension_numbers<[1], [0], [0], [1], [0, 0, 1, 1], [], []>} : vector<24x12xbf16>, vector<12x6xbf16>, vector<24x6xf32> -> vector<24x6xf32>
    %c0_5 = arith.constant 0 : index
    %c0_6 = arith.constant 0 : index
    %c0_7 = arith.constant 0 : index
    %10 = vector.load %arg5[%c0_5, %c0_6, %c0_7] : memref<2x1x6xf32, #tpu.memory_space<vmem>>, vector<1x1x6xf32>
    %11 = vector.shape_cast %10 : vector<1x1x6xf32> to vector<1x6xf32>
    %12 = vector.broadcast %11 : vector<1x6xf32> to vector<24x6xf32>
    %13 = arith.addf %9, %12 : vector<24x6xf32>
    %c0_8 = arith.constant 0 : index
    %c0_9 = arith.constant 0 : index
    %c0_10 = arith.constant 0 : index
    %14 = vector.load %arg3[%c0_8, %c0_9, %c0_10] : memref<2x12x6xbf16, #tpu.memory_space<vmem>>, vector<1x12x6xbf16>
    %15 = vector.shape_cast %14 : vector<1x12x6xbf16> to vector<12x6xbf16>
    %cst_11 = arith.constant dense<0.000000e+00> : vector<24x6xf32>
    %16 = tpu.matmul %1, %15, %cst_11 {dimension_numbers = #tpu.dot_dimension_numbers<[1], [0], [0], [1], [0, 0, 1, 1], [], []>} : vector<24x12xbf16>, vector<12x6xbf16>, vector<24x6xf32> -> vector<24x6xf32>
    %c0_12 = arith.constant 0 : index
    %c0_13 = arith.constant 0 : index
    %c0_14 = arith.constant 0 : index
    %17 = vector.load %arg6[%c0_12, %c0_13, %c0_14] : memref<2x1x6xf32, #tpu.memory_space<vmem>>, vector<1x1x6xf32>
    %18 = vector.shape_cast %17 : vector<1x1x6xf32> to vector<1x6xf32>
    %19 = vector.broadcast %18 : vector<1x6xf32> to vector<24x6xf32>
    %20 = arith.addf %16, %19 : vector<24x6xf32>
    %c0_15 = arith.constant 0 : index
    %c0_16 = arith.constant 0 : index
    %c0_17 = arith.constant 0 : index
    %21 = vector.load %arg4[%c0_15, %c0_16, %c0_17] : memref<2x12x6xbf16, #tpu.memory_space<vmem>>, vector<1x12x6xbf16>
    %22 = vector.shape_cast %21 : vector<1x12x6xbf16> to vector<12x6xbf16>
    %cst_18 = arith.constant dense<0.000000e+00> : vector<24x6xf32>
    %23 = tpu.matmul %1, %22, %cst_18 {dimension_numbers = #tpu.dot_dimension_numbers<[1], [0], [0], [1], [0, 0, 1, 1], [], []>} : vector<24x12xbf16>, vector<12x6xbf16>, vector<24x6xf32> -> vector<24x6xf32>
    %c0_19 = arith.constant 0 : index
    %c0_20 = arith.constant 0 : index
    %c0_21 = arith.constant 0 : index
    %24 = vector.load %arg7[%c0_19, %c0_20, %c0_21] : memref<2x1x6xf32, #tpu.memory_space<vmem>>, vector<1x1x6xf32>
    %25 = vector.shape_cast %24 : vector<1x1x6xf32> to vector<1x6xf32>
    %26 = vector.broadcast %25 : vector<1x6xf32> to vector<24x6xf32>
    %27 = arith.addf %23, %26 : vector<24x6xf32>
    %28 = vector.shape_cast %13 : vector<24x6xf32> to vector<3x8x6xf32>
    %29 = arith.truncf %28 : vector<3x8x6xf32> to vector<3x8x6xbf16>
    %30 = vector.shape_cast %20 : vector<24x6xf32> to vector<3x8x6xf32>
    %31 = arith.truncf %30 : vector<3x8x6xf32> to vector<3x8x6xbf16>
    %32 = vector.shape_cast %27 : vector<24x6xf32> to vector<3x8x6xf32>
    %33 = arith.truncf %32 : vector<3x8x6xf32> to vector<3x8x6xbf16>
    "tpu.trace_start"() <{level = 10 : i32, message = "btd,bsd->bts"}> : () -> ()
    %cst_22 = arith.constant dense<0.000000e+00> : vector<3x8x8xf32>
    %34 = tpu.matmul %29, %31, %cst_22 {dimension_numbers = #tpu.dot_dimension_numbers<[2], [2], [1], [1], [0, 0, 0, 1, 1, 1], [0], [0]>} : vector<3x8x6xbf16>, vector<3x8x6xbf16>, vector<3x8x8xf32> -> vector<3x8x8xf32>
    "tpu.trace_stop"() : () -> ()
    %cst_23 = arith.constant 0.408248305 : f32
    %35 = vector.broadcast %cst_23 : f32 to vector<3x8x8xf32>
    %36 = arith.mulf %34, %35 : vector<3x8x8xf32>
    %cst_24 = arith.constant -1.000000e+30 : f32
    %37 = vector.shape_cast %5 : vector<1x8x8xi1> to vector<1x8x8xi1>
    %38 = vector.broadcast %37 : vector<1x8x8xi1> to vector<3x8x8xi1>
    %39 = vector.broadcast %cst_24 : f32 to vector<3x8x8xf32>
    %40 = arith.select %38, %36, %39 : vector<3x8x8xi1>, vector<3x8x8xf32>
    %cst_25 = arith.constant dense<0xFF800000> : vector<3x8xf32>
    %41 = vector.multi_reduction <maximumf>, %40, %cst_25 [2] : vector<3x8x8xf32> to vector<3x8xf32>
    %42 = vector.shape_cast %41 : vector<3x8xf32> to vector<3x8x1xf32>
    %43 = vector.broadcast %42 : vector<3x8x1xf32> to vector<3x8x8xf32>
    %44 = arith.subf %40, %43 : vector<3x8x8xf32>
    %45 = math.exp %44 : vector<3x8x8xf32>
    %cst_26 = arith.constant dense<0.000000e+00> : vector<3x8xf32>
    %46 = vector.multi_reduction <add>, %45, %cst_26 [2] : vector<3x8x8xf32> to vector<3x8xf32>
    %47 = vector.shape_cast %46 : vector<3x8xf32> to vector<3x8x1xf32>
    %48 = arith.truncf %45 : vector<3x8x8xf32> to vector<3x8x8xbf16>
    "tpu.trace_start"() <{level = 10 : i32, message = "bts,bsd->btd"}> : () -> ()
    %cst_27 = arith.constant dense<0.000000e+00> : vector<3x8x6xf32>
    %49 = tpu.matmul %48, %33, %cst_27 {dimension_numbers = #tpu.dot_dimension_numbers<[2], [1], [1], [2], [0, 0, 0, 1, 1, 2], [0], [0]>} : vector<3x8x8xbf16>, vector<3x8x6xbf16>, vector<3x8x6xf32> -> vector<3x8x6xf32>
    "tpu.trace_stop"() : () -> ()
    %50 = tpu.reciprocal %47 {approx = true} : vector<3x8x1xf32> -> vector<3x8x1xf32>
    %51 = vector.broadcast %50 : vector<3x8x1xf32> to vector<3x8x6xf32>
    %52 = arith.mulf %49, %51 : vector<3x8x6xf32>
    %53 = vector.shape_cast %52 : vector<3x8x6xf32> to vector<24x6xf32>
    %54 = arith.truncf %53 : vector<24x6xf32> to vector<24x6xbf16>
    %c0_28 = arith.constant 0 : index
    %c0_29 = arith.constant 0 : index
    %c0_30 = arith.constant 0 : index
    %55 = vector.load %arg8[%c0_28, %c0_29, %c0_30] : memref<2x6x12xbf16, #tpu.memory_space<vmem>>, vector<1x6x12xbf16>
    %56 = vector.shape_cast %55 : vector<1x6x12xbf16> to vector<6x12xbf16>
    %cst_31 = arith.constant dense<0.000000e+00> : vector<24x12xf32>
    %57 = tpu.matmul %54, %56, %cst_31 {dimension_numbers = #tpu.dot_dimension_numbers<[1], [0], [0], [1], [0, 0, 1, 1], [], []>} : vector<24x6xbf16>, vector<6x12xbf16>, vector<24x12xf32> -> vector<24x12xf32>
    %58 = arith.addf %6, %57 : vector<24x12xf32>
    %c1 = arith.constant 1 : index
    %c0_32 = arith.constant 0 : index
    %c0_33 = arith.constant 0 : index
    %59 = vector.load %arg2[%c1, %c0_32, %c0_33] : memref<2x12x6xbf16, #tpu.memory_space<vmem>>, vector<1x12x6xbf16>
    %60 = vector.shape_cast %59 : vector<1x12x6xbf16> to vector<12x6xbf16>
    %cst_34 = arith.constant dense<0.000000e+00> : vector<24x6xf32>
    %61 = tpu.matmul %1, %60, %cst_34 {dimension_numbers = #tpu.dot_dimension_numbers<[1], [0], [0], [1], [0, 0, 1, 1], [], []>} : vector<24x12xbf16>, vector<12x6xbf16>, vector<24x6xf32> -> vector<24x6xf32>
    %c1_35 = arith.constant 1 : index
    %c0_36 = arith.constant 0 : index
    %c0_37 = arith.constant 0 : index
    %62 = vector.load %arg5[%c1_35, %c0_36, %c0_37] : memref<2x1x6xf32, #tpu.memory_space<vmem>>, vector<1x1x6xf32>
    %63 = vector.shape_cast %62 : vector<1x1x6xf32> to vector<1x6xf32>
    %64 = vector.broadcast %63 : vector<1x6xf32> to vector<24x6xf32>
    %65 = arith.addf %61, %64 : vector<24x6xf32>
    %c1_38 = arith.constant 1 : index
    %c0_39 = arith.constant 0 : index
    %c0_40 = arith.constant 0 : index
    %66 = vector.load %arg3[%c1_38, %c0_39, %c0_40] : memref<2x12x6xbf16, #tpu.memory_space<vmem>>, vector<1x12x6xbf16>
    %67 = vector.shape_cast %66 : vector<1x12x6xbf16> to vector<12x6xbf16>
    %cst_41 = arith.constant dense<0.000000e+00> : vector<24x6xf32>
    %68 = tpu.matmul %1, %67, %cst_41 {dimension_numbers = #tpu.dot_dimension_numbers<[1], [0], [0], [1], [0, 0, 1, 1], [], []>} : vector<24x12xbf16>, vector<12x6xbf16>, vector<24x6xf32> -> vector<24x6xf32>
    %c1_42 = arith.constant 1 : index
    %c0_43 = arith.constant 0 : index
    %c0_44 = arith.constant 0 : index
    %69 = vector.load %arg6[%c1_42, %c0_43, %c0_44] : memref<2x1x6xf32, #tpu.memory_space<vmem>>, vector<1x1x6xf32>
    %70 = vector.shape_cast %69 : vector<1x1x6xf32> to vector<1x6xf32>
    %71 = vector.broadcast %70 : vector<1x6xf32> to vector<24x6xf32>
    %72 = arith.addf %68, %71 : vector<24x6xf32>
    %c1_45 = arith.constant 1 : index
    %c0_46 = arith.constant 0 : index
    %c0_47 = arith.constant 0 : index
    %73 = vector.load %arg4[%c1_45, %c0_46, %c0_47] : memref<2x12x6xbf16, #tpu.memory_space<vmem>>, vector<1x12x6xbf16>
    %74 = vector.shape_cast %73 : vector<1x12x6xbf16> to vector<12x6xbf16>
    %cst_48 = arith.constant dense<0.000000e+00> : vector<24x6xf32>
    %75 = tpu.matmul %1, %74, %cst_48 {dimension_numbers = #tpu.dot_dimension_numbers<[1], [0], [0], [1], [0, 0, 1, 1], [], []>} : vector<24x12xbf16>, vector<12x6xbf16>, vector<24x6xf32> -> vector<24x6xf32>
    %c1_49 = arith.constant 1 : index
    %c0_50 = arith.constant 0 : index
    %c0_51 = arith.constant 0 : index
    %76 = vector.load %arg7[%c1_49, %c0_50, %c0_51] : memref<2x1x6xf32, #tpu.memory_space<vmem>>, vector<1x1x6xf32>
    %77 = vector.shape_cast %76 : vector<1x1x6xf32> to vector<1x6xf32>
    %78 = vector.broadcast %77 : vector<1x6xf32> to vector<24x6xf32>
    %79 = arith.addf %75, %78 : vector<24x6xf32>
    %80 = vector.shape_cast %65 : vector<24x6xf32> to vector<3x8x6xf32>
    %81 = arith.truncf %80 : vector<3x8x6xf32> to vector<3x8x6xbf16>
    %82 = vector.shape_cast %72 : vector<24x6xf32> to vector<3x8x6xf32>
    %83 = arith.truncf %82 : vector<3x8x6xf32> to vector<3x8x6xbf16>
    %84 = vector.shape_cast %79 : vector<24x6xf32> to vector<3x8x6xf32>
    %85 = arith.truncf %84 : vector<3x8x6xf32> to vector<3x8x6xbf16>
    "tpu.trace_start"() <{level = 10 : i32, message = "btd,bsd->bts"}> : () -> ()
    %cst_52 = arith.constant dense<0.000000e+00> : vector<3x8x8xf32>
    %86 = tpu.matmul %81, %83, %cst_52 {dimension_numbers = #tpu.dot_dimension_numbers<[2], [2], [1], [1], [0, 0, 0, 1, 1, 1], [0], [0]>} : vector<3x8x6xbf16>, vector<3x8x6xbf16>, vector<3x8x8xf32> -> vector<3x8x8xf32>
    "tpu.trace_stop"() : () -> ()
    %cst_53 = arith.constant 0.408248305 : f32
    %87 = vector.broadcast %cst_53 : f32 to vector<3x8x8xf32>
    %88 = arith.mulf %86, %87 : vector<3x8x8xf32>
    %cst_54 = arith.constant -1.000000e+30 : f32
    %89 = vector.shape_cast %5 : vector<1x8x8xi1> to vector<1x8x8xi1>
    %90 = vector.broadcast %89 : vector<1x8x8xi1> to vector<3x8x8xi1>
    %91 = vector.broadcast %cst_54 : f32 to vector<3x8x8xf32>
    %92 = arith.select %90, %88, %91 : vector<3x8x8xi1>, vector<3x8x8xf32>
    %cst_55 = arith.constant dense<0xFF800000> : vector<3x8xf32>
    %93 = vector.multi_reduction <maximumf>, %92, %cst_55 [2] : vector<3x8x8xf32> to vector<3x8xf32>
    %94 = vector.shape_cast %93 : vector<3x8xf32> to vector<3x8x1xf32>
    %95 = vector.broadcast %94 : vector<3x8x1xf32> to vector<3x8x8xf32>
    %96 = arith.subf %92, %95 : vector<3x8x8xf32>
    %97 = math.exp %96 : vector<3x8x8xf32>
    %cst_56 = arith.constant dense<0.000000e+00> : vector<3x8xf32>
    %98 = vector.multi_reduction <add>, %97, %cst_56 [2] : vector<3x8x8xf32> to vector<3x8xf32>
    %99 = vector.shape_cast %98 : vector<3x8xf32> to vector<3x8x1xf32>
    %100 = arith.truncf %97 : vector<3x8x8xf32> to vector<3x8x8xbf16>
    "tpu.trace_start"() <{level = 10 : i32, message = "bts,bsd->btd"}> : () -> ()
    %cst_57 = arith.constant dense<0.000000e+00> : vector<3x8x6xf32>
    %101 = tpu.matmul %100, %85, %cst_57 {dimension_numbers = #tpu.dot_dimension_numbers<[2], [1], [1], [2], [0, 0, 0, 1, 1, 2], [0], [0]>} : vector<3x8x8xbf16>, vector<3x8x6xbf16>, vector<3x8x6xf32> -> vector<3x8x6xf32>
    "tpu.trace_stop"() : () -> ()
    %102 = tpu.reciprocal %99 {approx = true} : vector<3x8x1xf32> -> vector<3x8x1xf32>
    %103 = vector.broadcast %102 : vector<3x8x1xf32> to vector<3x8x6xf32>
    %104 = arith.mulf %101, %103 : vector<3x8x6xf32>
    %105 = vector.shape_cast %104 : vector<3x8x6xf32> to vector<24x6xf32>
    %106 = arith.truncf %105 : vector<24x6xf32> to vector<24x6xbf16>
    %c1_58 = arith.constant 1 : index
    %c0_59 = arith.constant 0 : index
    %c0_60 = arith.constant 0 : index
    %107 = vector.load %arg8[%c1_58, %c0_59, %c0_60] : memref<2x6x12xbf16, #tpu.memory_space<vmem>>, vector<1x6x12xbf16>
    %108 = vector.shape_cast %107 : vector<1x6x12xbf16> to vector<6x12xbf16>
    %cst_61 = arith.constant dense<0.000000e+00> : vector<24x12xf32>
    %109 = tpu.matmul %106, %108, %cst_61 {dimension_numbers = #tpu.dot_dimension_numbers<[1], [0], [0], [1], [0, 0, 1, 1], [], []>} : vector<24x6xbf16>, vector<6x12xbf16>, vector<24x12xf32> -> vector<24x12xf32>
    %110 = arith.addf %58, %109 : vector<24x12xf32>
    %c0_62 = arith.constant 0 : index
    %c0_63 = arith.constant 0 : index
    %111 = vector.load %arg9[%c0_62, %c0_63] : memref<1x12xf32, #tpu.memory_space<vmem>>, vector<1x12xf32>
    %112 = vector.broadcast %111 : vector<1x12xf32> to vector<24x12xf32>
    %113 = arith.addf %110, %112 : vector<24x12xf32>
    %c0_64 = arith.constant 0 : index
    %c0_65 = arith.constant 0 : index
    %114 = vector.load %arg10[%c0_64, %c0_65] : memref<24x12xf32, #tpu.memory_space<vmem>>, vector<24x12xf32>
    tpu.vector_store %arg10[%c0_64, %c0_65], %113 {strides = array<i32>} : memref<24x12xf32, #tpu.memory_space<vmem>>, vector<24x12xf32>,
    return
  }
  func.func @transform_0(%arg0: i32) -> (i32, i32) {
    %c0_i32 = arith.constant 0 : i32
    %c0_i32_0 = arith.constant 0 : i32
    return %arg0, %c0_i32 : i32, i32
  }
  func.func @transform_1(%arg0: i32) -> (i32, i32, i32) {
    %c0_i32 = arith.constant 0 : i32
    %c0_i32_0 = arith.constant 0 : i32
    %c0_i32_1 = arith.constant 0 : i32
    %c0_i32_2 = arith.constant 0 : i32
    return %c0_i32, %c0_i32_0, %c0_i32_1 : i32, i32, i32
  }
  func.func @transform_2(%arg0: i32) -> (i32, i32, i32) {
    %c0_i32 = arith.constant 0 : i32
    %c0_i32_0 = arith.constant 0 : i32
    %c0_i32_1 = arith.constant 0 : i32
    %c0_i32_2 = arith.constant 0 : i32
    return %c0_i32, %c0_i32_0, %c0_i32_1 : i32, i32, i32
  }
  func.func @transform_3(%arg0: i32) -> (i32, i32, i32) {
    %c0_i32 = arith.constant 0 : i32
    %c0_i32_0 = arith.constant 0 : i32
    %c0_i32_1 = arith.constant 0 : i32
    %c0_i32_2 = arith.constant 0 : i32
    return %c0_i32, %c0_i32_0, %c0_i32_1 : i32, i32, i32
  }
  func.func @transform_4(%arg0: i32) -> (i32, i32, i32) {
    %c0_i32 = arith.constant 0 : i32
    %c0_i32_0 = arith.constant 0 : i32
    %c0_i32_1 = arith.constant 0 : i32
    %c0_i32_2 = arith.constant 0 : i32
    return %c0_i32, %c0_i32_0, %c0_i32_1 : i32, i32, i32
  }
  func.func @transform_5(%arg0: i32) -> (i32, i32, i32) {
    %c0_i32 = arith.constant 0 : i32
    %c0_i32_0 = arith.constant 0 : i32
    %c0_i32_1 = arith.constant 0 : i32
    %c0_i32_2 = arith.constant 0 : i32
    return %c0_i32, %c0_i32_0, %c0_i32_1 : i32, i32, i32
  }
  func.func @transform_6(%arg0: i32) -> (i32, i32, i32) {
    %c0_i32 = arith.constant 0 : i32
    %c0_i32_0 = arith.constant 0 : i32
    %c0_i32_1 = arith.constant 0 : i32
    %c0_i32_2 = arith.constant 0 : i32
    return %c0_i32, %c0_i32_0, %c0_i32_1 : i32, i32, i32
  }
  func.func @transform_7(%arg0: i32) -> (i32, i32, i32) {
    %c0_i32 = arith.constant 0 : i32
    %c0_i32_0 = arith.constant 0 : i32
    %c0_i32_1 = arith.constant 0 : i32
    %c0_i32_2 = arith.constant 0 : i32
    return %c0_i32, %c0_i32_0, %c0_i32_1 : i32, i32, i32
  }
  func.func @transform_8(%arg0: i32) -> (i32, i32) {
    %c0_i32 = arith.constant 0 : i32
    %c0_i32_0 = arith.constant 0 : i32
    %c0_i32_1 = arith.constant 0 : i32
    return %c0_i32, %c0_i32_0 : i32, i32
  }
  func.func @transform_9(%arg0: i32) -> (i32, i32) {
    %c0_i32 = arith.constant 0 : i32
    %c0_i32_0 = arith.constant 0 : i32
    return %arg0, %c0_i32 : i32, i32
  }
}

</mosaic_0001>

<bundles_post_ra>
// kernel: tpu_custom_call.1
= control target key start
LH: loop header
LB: loop body
LE: loop exit
PB: predicated region body
PF: predicated region fallthrough
CT: control target
= control target key end

     0   :  { %s1192_s30 = smov 0   ;;  %s1393_s0 = inlined_call_operand.vmem [shape: f32[48,12], index: 0, kind: input, shape index: {}]   ;;  %s1394_s1 = inlined_call_operand.vmem [shape: bf16[2,12,6], index: 1, kind: input, shape index: {}]   ;;  %s1395_s2 = inlined_call_operand.vmem [shape: bf16[2,12,6], index: 2, kind: input, shape index: {}]   ;;  %s1396_s3 = inlined_call_operand.vmem [shape: bf16[2,12,6], index: 3, kind: input, shape index: {}]   ;;  %s1397_s4 = inlined_call_operand.vmem [shape: f32[2,1,6], index: 4, kind: input, shape index: {}]   ;;  %s1398_s5 = inlined_call_operand.vmem [shape: f32[2,1,6], index: 5, kind: input, shape index: {}]   ;;  %s1399_s6 = inlined_call_operand.vmem [shape: f32[2,1,6], index: 6, kind: input, shape index: {}]   ;;  %s1400_s7 = inlined_call_operand.vmem [shape: bf16[2,6,12], index: 7, kind: input, shape index: {}]   ;;  %s1401_s8 = inlined_call_operand.vmem [shape: f32[1,12], index: 8, kind: input, shape index: {}]   ;;  %s1402_s9 = inlined_call_operand.vmem [shape: f32[48,12], index: 9, kind: output, shape index: {}]  }
   0x1 LB: > { %s1016_s10 = sadd.s32 4294967295, %s1140_s30   ;;  %p1020_p0 = scmp.ge.s32.totalorder %s1140_s30, 1  ;;  %s1140_s30 = sphi %s1192_s30, %s19_s30  }
   0x2   : > { %p288_p1 = scmp.lt.s32.totalorder %s1140_s30, 3 }
   0x4   : > { %p289_p2 = pnand %p1020_p0, %p288_p1 }
   0x5   : > { %s324_s15 = smul.u32 (!%p289_p2), 3, %s1016_s10 }
   0x6   : > { %292 = sbr.rel (%p289_p2) target bundleno = 1143 (0x477), region = 56 }
   0x7   : > { %p325_p3 = scmp.lt.s32.totalorder (!%p289_p2), %s324_s15, 5 }
   0xb   : > { %v1025_v0 = vld [vmem:[%s1394_s1] sm:$0xf]  ;;  %v1087_v1 = vld [vmem:[%s1394_s1] sm:$0x30]  ;;  %vm365_vm0 = vcmask 1045504   ;;  %s1406_s15 = smov (!%p325_p3, %s324_s15), 5  ;;  %v342_v42 = vlaneseq }
   0xc   : > { %v1026_v2 = vor.u32 %v1087_v1, %v1025_v0  ;;  %v1031_v3 = vld [vmem:[%s1395_s2] sm:$0xf]  ;;  %v1088_v4 = vld [vmem:[%s1395_s2] sm:$0x30]  ;;  %s1021_s20 = sshll.u32 %s1406_s15, 3  ;;  %vm358_vm1 = vcmask 97280  }
   0xd   : > { %v1032_v5 = vor.u32 %v1088_v4, %v1031_v3  ;;  %s328_s23 = scalar_lea.vmem %s1393_s0, %s1021_s20  ;;  %v1104_v13 = vld [vmem:[%s1398_s5] ss:$0 sm:$0xff]  ;;  %v1089_v15 = vld [vmem:[%s1396_s3] sm:$0x30]  ;;  %vm460_vm2 = vcmask 48128   ;;  %v343_v43 = vshrl.u32 %v342_v42, 7  ;;  %s334_s24 = scalar_lea.vmem %s1402_s9, %s1021_s20 }
   0xe   : > { %v367_v6 = vsel %vm365_vm0, %v1026_v2, 0  ;;  %v337_v8 = vld [vmem:[%s328_s23] sm:$0xff]  ;;  %v338_v9 = vld [vmem:[%s328_s23 + $0x8] sm:$0xff]  ;;  %v339_v10 = vld [vmem:[%s328_s23 + $0x10] sm:$0xff]  ;;  %v345_v44 = vand.u32 127, %v342_v42  ;;  %vm526_vm4 = vcmask 64512  }
   0xf   : > { %376 = vmatpush.bf16.msra.mxu0 %v367_v6  ;;  %v399_v7 = vsel %vm365_vm0, %v1032_v5, 0  ;;  %1093 = vmatpush.bf16.msra.mxu2 %v367_v6  ;;  %v1222_v11 = vpack.c.bf16 %v338_v9, %v337_v8  ;;  %v1224_v12 = vpack.c.bf16 %v339_v10, %v339_v10  ;;  %v1037_v14 = vld [vmem:[%s1396_s3] sm:$0xf]  ;;  %vm560_vm5 = vcmask 1043456   ;;  %v1061_v9 = vld [vmem:[%s1395_s2 + $0x8] sm:$0xf] }
  0x10   : > { %408 = vmatpush.bf16.msra.mxu1 %v399_v7  ;;  %1094 = vmatpush.bf16.msra.mxu3 %v399_v7  ;;  %v1038_v16 = vor.u32 %v1089_v15, %v1037_v14  ;;  %v1103_v19 = vld [vmem:[%s1397_s4] ss:$0 sm:$0xff]  ;;  %vm1257_vm3 = vcmp.ge.s32.totalorder %v343_v43, %v345_v44  ;;  %v1091_v10 = vld [vmem:[%s1395_s2 + $0x8] sm:$0x30]  ;;  %v1052_v15 = vld [vmem:[%s1394_s1 + $0x8] sm:$0xf] }
  0x11   : > { %v1105_v61 = vld [vmem:[%s1399_s6] ss:$0 sm:$0xff]  ;;  %v1062_v14 = vor.u32 %v1091_v10, %v1061_v9  ;;  %v1106_v42 = vld [vmem:[%s1398_s5 + $0x1] ss:$0 sm:$0xff]  ;;  %v1070_v43 = vld [vmem:[%s1396_s3 + $0x8] sm:$0xf] }
  0x12   : > { %1027 = vmatmul.msk.bf16.vlgmr.msra.gmra.mxu0 %vm358_vm1, %v1222_v11  ;;  %1028 = vmatmul.msk.bf16.vlgmr.msra.gmra.mxu2 %vm358_vm1, %v1224_v12  ;;  %v431_v18 = vsel %vm365_vm0, %v1038_v16, 0  ;;  %v1090_v16 = vld [vmem:[%s1394_s1 + $0x8] sm:$0x30]  ;;  %vm901_vm6 = vcmask 1042432  }
  0x13   : > { %1033 = vmatmul.msk.bf16.vlgmr.msra.gmra.mxu1 %vm358_vm1, %v1222_v11  ;;  %1034 = vmatmul.msk.bf16.vlgmr.msra.gmra.mxu3 %vm358_vm1, %v1224_v12  ;;  %v1092_v44 = vld [vmem:[%s1396_s3 + $0x8] sm:$0x30] }
  0x14   : > { %440 = vmatpush.bf16.msrb.mxu2 %v431_v18  ;;  %v672_v18 = vsel %vm365_vm0, %v1062_v14, 0 }
  0x22   : > { %1039 = vmatmul.msk.bf16.vlgmr.msrb.gmra.mxu2 %vm358_vm1, %v1222_v11 }
  0x32   : > { %1040 = vmatmul.msk.bf16.gmra.mxu2 %vm358_vm1, %v1224_v12 }
  0x8f   : > { %v378_v22 = vpop.f32.mrf.mxu0 }
  0x90   : > { %v410_v17 = vpop.f32.mrf.mxu1  ;;  %v379_v23 = vadd.f32 %v1103_v19, %v378_v22 }
  0x91   : > { %v411_v20 = vadd.f32 %v1104_v13, %v410_v17  ;;  %v1053_v17 = vor.u32 %v1090_v16, %v1052_v15 }
  0x92   : > { %v451_v29 = vpack.c.bf16 %v379_v23, %v379_v23 }
  0x93   : > { %v454_v21 = vpack.c.bf16 %v411_v20, %v411_v20  ;;  %v638_v20 = vsel %vm365_vm0, %v1053_v17, 0 }
  0x95   : > { %v465_v24 = vsel %vm460_vm2, %v454_v21, 0  ;;  %v383_v26 = vpop.f32.mrf.mxu2 }
  0x96   : > { %474 = vmatpush.bf16.xpose.msrb.mxu3 %v465_v24  ;;  %v415_v25 = vpop.f32.mrf.mxu3  ;;  %v384_v34 = vadd.f32 %v1103_v19, %v383_v26 }
  0x97   : > { %v416_v28 = vadd.f32 %v1104_v13, %v415_v25  ;;  %v380_v39 = vpop.f32.mrf.mxu0 }
  0x98   : > { %v412_v27 = vpop.f32.mrf.mxu1  ;;  %v453_v38 = vpack.c.bf16 %v384_v34, %v384_v34  ;;  %v381_v40 = vadd.f32 %v1103_v19, %v380_v39 }
  0x99   : > { %v413_v30 = vadd.f32 %v1104_v13, %v412_v27  ;;  %v456_v31 = vpack.c.bf16 %v416_v28, %v416_v28 }
  0x9a   : > { %v452_v41 = vpack.c.bf16 %v381_v40, %v381_v40 }
  0x9b   : > { %v455_v32 = vpack.c.bf16 %v413_v30, %v413_v30  ;;  %v503_v33 = vsel %vm460_vm2, %v456_v31, 0 }
  0x9c   : > { %512 = vmatpush.bf16.xpose.msrb.mxu0 %v503_v33 }
  0x9d   : > { %v484_v35 = vsel %vm460_vm2, %v455_v32, 0  ;;  %1041 = vmatmul.msk.bf16.vlgmr.msrb.gmra.mxu3 %vm460_vm2, %v451_v29  ;;  %v385_v37 = vpop.f32.mrf.mxu2 }
  0x9e   : > { %493 = vmatpush.bf16.xpose.msra.mxu3 %v484_v35  ;;  %v417_v36 = vpop.f32.mrf.mxu3 }
  0xa3   : > { %1043 = vmatmul.msk.bf16.vlgmr.msrb.gmra.mxu0 %vm460_vm2, %v453_v38 }
  0xa4   : > { %647 = vmatpush.bf16.msra.mxu0 %v638_v20 }
  0xa5   : > { %v442_v62 = vpop.f32.mrf.mxu2 }
  0xa6   : > { %v443_v63 = vadd.f32 %v1105_v61, %v442_v62 }
  0xa8   : > { %v457_v0 = vpack.c.bf16 %v443_v63, %v443_v63 }
  0xaa   : > { %v562_v3 = vsel %vm560_vm5, %v457_v0, 0 }
  0xab   : > { %571 = vmatpush.bf16.msrb.mxu1 %v562_v3 }
  0xad   : > { %1042 = vmatmul.msk.bf16.vlgmr.msra.gmra.mxu3 %vm460_vm2, %v452_v41  ;;  %v444_v1 = vpop.f32.mrf.mxu2 }
  0xae   : > { %v445_v2 = vadd.f32 %v1105_v61, %v444_v1 }
  0xaf   : > { %681 = vmatpush.bf16.msra.mxu1 %v672_v18 }
  0xb0   : > { %v458_v4 = vpack.c.bf16 %v445_v2, %v445_v2 }
  0xb2   : > { %v581_v5 = vsel %vm560_vm5, %v458_v4, 0 }
  0xb3   : > { %590 = vmatpush.bf16.msra.mxu2 %v581_v5  ;;  %1054 = vmatmul.msk.bf16.vlgmr.msra.gmra.mxu0 %vm358_vm1, %v1222_v11 }
  0xb5   : > { %v447_v6 = vpop.f32.mrf.mxu2 }
  0xb6   : > { %v448_v7 = vadd.f32 %v1105_v61, %v447_v6 }
  0xb8   : > { %v459_v8 = vpack.c.bf16 %v448_v7, %v448_v7 }
  0xba   : > { %v600_v13 = vsel %vm560_vm5, %v459_v8, 0 }
  0xbb   : > { %609 = vmatpush.bf16.msrb.mxu3 %v600_v13 }
  0xbd   : > { %v449_v19 = vpop.f32.mrf.mxu2 }
  0xc3   : > { %1055 = vmatmul.msk.bf16.gmra.mxu0 %vm358_vm1, %v1224_v12 }
 0x120   : > { %v476_v45 = vpop.f32.mrf.mxu3  ;;  %v514_v48 = vpop.f32.mrf.mxu0 }
 0x121   : > { %v518_v47 = vmul.f32 0.4082483, %v476_v45  ;;  %v520_v50 = vmul.f32 0.4082483, %v514_v48  ;;  %v1071_v48 = vor.u32 %v1092_v44, %v1070_v43 }
 0x123   : > { %v523_v49 = vsel %vm1257_vm3, %v518_v47, -1e+30  ;;  %v525_v52 = vsel %vm1257_vm3, %v520_v50, -1e+30  ;;  %v706_v50 = vsel %vm365_vm0, %v1071_v48, 0 }
 0x124   : > { %v527_v51 = vsel %vm526_vm4, %v523_v49, -inf  ;;  %v533_v55 = vsel %vm526_vm4, %v525_v52, -inf  ;;  %715 = vmatpush.bf16.msrb.mxu2 %v706_v50 }
 0x125   : > { %528 = vmax.xlane.f32.xlu0 %v527_v51 }
 0x128   : > { %v478_v53 = vpop.f32.mrf.mxu3  ;;  %v516_v54 = vpop.f32.mrf.mxu0 }
 0x12d   : > { %534 = vmax.xlane.f32.xlu0 %v533_v55 }
 0x130   : > { %v495_v56 = vpop.f32.mrf.mxu3  ;;  %v649_v37 = vpop.f32.mrf.mxu0 }
 0x131   : > { %v519_v57 = vmul.f32 0.4082483, %v495_v56 }
 0x133   : > { %v524_v58 = vsel %vm1257_vm3, %v519_v57, -1e+30 }
 0x134   : > { %v530_v59 = vsel %vm526_vm4, %v524_v58, -inf }
 0x135   : > { %531 = vmax.xlane.f32.xlu1 %v530_v59 }
 0x138   : > { %v497_v60 = vpop.f32.mrf.mxu3  ;;  %v651_v38 = vpop.f32.mrf.mxu0 }
 0x140   : > { %v654_v40 = vpop.f32.mrf.mxu0 }
 0x148   : > { %v656_v47 = vpop.f32.mrf.mxu0 }
 0x198   : > { %v529_v21 = vpop.xlane.xlu0 %528 }
 0x199   : > { %v536_v22 = vsub.f32 %v523_v49, %v529_v21 }
 0x19b   : > { %v539_v23 = vmul.f32 1.442695, %v536_v22 }
 0x19d   : > { %1110 = vpow2.f32 %v539_v23 }
 0x1a0   : > { %v535_v24 = vpop.xlane.xlu0 %534 }
 0x1a1   : > { %v538_v25 = vsub.f32 %v525_v52, %v535_v24  ;;  %v1107_v52 = vld [vmem:[%s1397_s4 + $0x1] ss:$0 sm:$0xff] }
 0x1a2   : > { %v650_v55 = vadd.f32 %v1107_v52, %v649_v37  ;;  %v655_v3 = vadd.f32 %v1107_v52, %v654_v40  ;;  %v652_v4 = vadd.f32 %v1107_v52, %v651_v38 }
 0x1a3   : > { %v1111_v26 = vpop.eup %1110  ;;  %v543_v27 = vmul.f32 1.442695, %v538_v25 }
 0x1a4   : > { %v545_v28 = vsel %vm526_vm4, %v1111_v26, 0.0  ;;  %v554_v29 = vpack.c.bf16 %v1111_v26, %v1111_v26  ;;  %v726_v59 = vpack.c.bf16 %v650_v55, %v650_v55  ;;  %v728_v6 = vpack.c.bf16 %v655_v3, %v655_v3 }
 0x1a5   : > { %546 = vadd.xlane.f32.xlu0 %v545_v28  ;;  %1112 = vpow2.f32 %v543_v27  ;;  %v727_v7 = vpack.c.bf16 %v652_v4, %v652_v4 }
 0x1a6   : > { %1044 = vmatmul.msk.bf16.vlgmr.msrb.gmra.mxu1 %vm526_vm4, %v554_v29 }
 0x1a8   : > { %v532_v30 = vpop.xlane.xlu1 %531 }
 0x1a9   : > { %v537_v31 = vsub.f32 %v524_v58, %v532_v30 }
 0x1ab   : > { %v1296_v32 = vpop.eup %1112  ;;  %v541_v33 = vmul.f32 1.442695, %v537_v31 }
 0x1ac   : > { %v556_v34 = vpack.c.bf16 %v1296_v32, %v1296_v32 }
 0x1ad   : > { %1114 = vpow2.f32 %v541_v33 }
 0x1ae   : > { %1046 = vmatmul.msk.bf16.vlgmr.msrb.gmra.mxu3 %vm526_vm4, %v556_v34 }
 0x1b3   : > { %v1301_v35 = vpop.eup %1114 }
 0x1b4   : > { %v555_v36 = vpack.c.bf16 %v1301_v35, %v1301_v35  ;;  %v548_v34 = vsel %vm526_vm4, %v1301_v35, 0.0 }
 0x1b6   : > { %1045 = vmatmul.msk.bf16.vlgmr.msra.gmra.mxu2 %vm526_vm4, %v555_v36  ;;  %1063 = vmatmul.msk.bf16.vlgmr.msra.gmra.mxu1 %vm358_vm1, %v1222_v11  ;;  %v551_v36 = vsel %vm526_vm4, %v1296_v32, 0.0 }
 0x1c6   : > { %1064 = vmatmul.msk.bf16.gmra.mxu1 %vm358_vm1, %v1224_v12  ;;  %1072 = vmatmul.msk.bf16.vlgmr.msrb.gmra.mxu2 %vm358_vm1, %v1222_v11 }
 0x1d6   : > { %1073 = vmatmul.msk.bf16.gmra.mxu2 %vm358_vm1, %v1224_v12  ;;  %v1108_v12 = vld [vmem:[%s1399_s6 + $0x1] ss:$0 sm:$0xff] }
 0x223   : > { %v1310_v39 = vpop.f32.mrf.mxu1 }
 0x22b   : > { %v575_v41 = vpop.f32.mrf.mxu1 }
 0x231   : > { %v1321_v45 = vpop.f32.mrf.mxu3 }
 0x233   : > { %v683_v49 = vpop.f32.mrf.mxu1 }
 0x234   : > { %v684_v51 = vadd.f32 %v1106_v42, %v683_v49 }
 0x236   : > { %v729_v53 = vpack.c.bf16 %v684_v51, %v684_v51 }
 0x238   : > { %v739_v54 = vsel %vm460_vm2, %v729_v53, 0 }
 0x239   : > { %v1330_v56 = vpop.f32.mrf.mxu2  ;;  %748 = vmatpush.bf16.xpose.msra.mxu3 %v739_v54  ;;  %v613_v57 = vpop.f32.mrf.mxu3 }
 0x23b   : > { %v685_v58 = vpop.f32.mrf.mxu1 }
 0x23c   : > { %v686_v60 = vadd.f32 %v1106_v42, %v685_v58  ;;  %v547_v58 = vpop.xlane.xlu0 %546 }
 0x23e   : > { %v730_v61 = vpack.c.bf16 %v686_v60, %v686_v60 }
 0x240   : > { %v758_v62 = vsel %vm460_vm2, %v730_v61, 0  ;;  %1074 = vmatmul.msk.bf16.vlgmr.msra.gmra.mxu3 %vm460_vm2, %v726_v59 }
 0x241   : > { %v594_v63 = vpop.f32.mrf.mxu2  ;;  %767 = vmatpush.bf16.xpose.msrb.mxu3 %v758_v62 }
 0x243   : > { %v688_v0 = vpop.f32.mrf.mxu1 }
 0x244   : > { %v689_v1 = vadd.f32 %v1106_v42, %v688_v0  ;;  %v623_v42 = vld [vmem:[%s1400_s7] sm:$0x7] }
 0x245   : > { %v930_v35 = vsel %vm901_vm6, %v623_v42, 0 }
 0x246   : > { %v731_v11 = vpack.c.bf16 %v689_v1, %v689_v1 }
 0x248   : > { %v777_v2 = vsel %vm460_vm2, %v731_v11, 0 }
 0x249   : > { %786 = vmatpush.bf16.xpose.msrb.mxu0 %v777_v2  ;;  %v717_v14 = vpop.f32.mrf.mxu2 }
 0x24a   : > { %v718_v15 = vadd.f32 %v1108_v12, %v717_v14 }
 0x24b   : > { %v690_v5 = vpop.f32.mrf.mxu1 }
 0x24c   : > { %v732_v17 = vpack.c.bf16 %v718_v15, %v718_v15 }
 0x24e   : > { %v832_v20 = vsel %vm560_vm5, %v732_v17, 0 }
 0x24f   : > { %841 = vmatpush.bf16.msrb.mxu1 %v832_v20 }
 0x250   : > { %1075 = vmatmul.msk.bf16.vlgmr.msrb.gmra.mxu3 %vm460_vm2, %v727_v7  ;;  %1076 = vmatmul.msk.bf16.vlgmr.msrb.gmra.mxu0 %vm460_vm2, %v728_v6 }
 0x251   : > { %v719_v22 = vpop.f32.mrf.mxu2 }
 0x252   : > { %v720_v24 = vadd.f32 %v1108_v12, %v719_v22 }
 0x253   : > { %939 = vmatpush.bf16.msra.mxu1 %v930_v35 }
 0x254   : > { %v733_v26 = vpack.c.bf16 %v720_v24, %v720_v24 }
 0x256   : > { %v851_v29 = vsel %vm560_vm5, %v733_v26, 0 }
 0x257   : > { %860 = vmatpush.bf16.msra.mxu2 %v851_v29 }
 0x259   : > { %v722_v37 = vpop.f32.mrf.mxu2 }
 0x25a   : > { %v723_v38 = vadd.f32 %v1108_v12, %v722_v37 }
 0x25c   : > { %v734_v40 = vpack.c.bf16 %v723_v38, %v723_v38 }
 0x25e   : > { %v870_v41 = vsel %vm560_vm5, %v734_v40, 0 }
 0x25f   : > { %879 = vmatpush.bf16.msra.mxu3 %v870_v41 }
 0x261   : > { %v724_v46 = vpop.f32.mrf.mxu2 }
 0x2c3   : > { %v750_v8 = vpop.f32.mrf.mxu3 }
 0x2c4   : > { %v792_v9 = vmul.f32 0.4082483, %v750_v8 }
 0x2c6   : > { %v795_v10 = vsel %vm1257_vm3, %v792_v9, -1e+30  ;;  %v1080_v9 = vld [vmem:[%s1400_s7 + $0x4] sm:$0x7] }
 0x2c7   : > { %v798_v13 = vsel %vm526_vm4, %v795_v10, -inf }
 0x2c8   : > { %799 = vmax.xlane.f32.xlu2 %v798_v13 }
 0x2cb   : > { %v752_v16 = vpop.f32.mrf.mxu3 }
 0x2cd   : > { %v788_v18 = vpop.f32.mrf.mxu0 }
 0x2ce   : > { %v794_v19 = vmul.f32 0.4082483, %v788_v18 }
 0x2d0   : > { %v797_v21 = vsel %vm1257_vm3, %v794_v19, -1e+30 }
 0x2d1   : > { %v804_v23 = vsel %vm526_vm4, %v797_v21, -inf }
 0x2d2   : > { %805 = vmax.xlane.f32.xlu2 %v804_v23 }
 0x2d3   : > { %v769_v25 = vpop.f32.mrf.mxu3 }
 0x2d4   : > { %v793_v27 = vmul.f32 0.4082483, %v769_v25 }
 0x2d5   : > { %v790_v28 = vpop.f32.mrf.mxu0 }
 0x2d6   : > { %v796_v30 = vsel %vm1257_vm3, %v793_v27, -1e+30 }
 0x2d7   : > { %v801_v31 = vsel %vm526_vm4, %v796_v30, -inf }
 0x2d8   : > { %802 = vmax.xlane.f32.xlu1 %v801_v31 }
 0x2db   : > { %v771_v33 = vpop.f32.mrf.mxu3 }
 0x2e0   : > { %549 = vadd.xlane.f32.xlu1 %v548_v34 }
 0x2e8   : > { %552 = vadd.xlane.f32.xlu1 %v551_v36 }
 0x33b   : > { %v800_v43 = vpop.xlane.xlu2 %799 }
 0x33c   : > { %v807_v44 = vsub.f32 %v795_v10, %v800_v43  ;;  %v903_v10 = vsel %vm901_vm6, %v1080_v9, 0 }
 0x33d   : > { %912 = vmatpush.bf16.msra.mxu0 %v903_v10 }
 0x33e   : > { %v810_v47 = vmul.f32 1.442695, %v807_v44 }
 0x340   : > { %1116 = vpow2.f32 %v810_v47 }
 0x345   : > { %v806_v32 = vpop.xlane.xlu2 %805 }
 0x346   : > { %v1117_v48 = vpop.eup %1116  ;;  %v809_v49 = vsub.f32 %v797_v21, %v806_v32 }
 0x347   : > { %v825_v50 = vpack.c.bf16 %v1117_v48, %v1117_v48  ;;  %v816_v51 = vsel %vm526_vm4, %v1117_v48, 0.0 }
 0x348   : > { %v814_v52 = vmul.f32 1.442695, %v809_v49  ;;  %817 = vadd.xlane.f32.xlu2 %v816_v51 }
 0x349   : > { %1077 = vmatmul.msk.bf16.vlgmr.msrb.gmra.mxu1 %vm526_vm4, %v825_v50 }
 0x34a   : > { %1118 = vpow2.f32 %v814_v52 }
 0x34b   : > { %v803_v53 = vpop.xlane.xlu1 %802 }
 0x34c   : > { %v808_v54 = vsub.f32 %v796_v30, %v803_v53  ;;  %v1109_v30 = vld [vmem:[%s1401_s8] ss:$0 sm:$0xff] }
 0x34e   : > { %v812_v55 = vmul.f32 1.442695, %v808_v54 }
 0x350   : > { %v1119_v57 = vpop.eup %1118  ;;  %1120 = vpow2.f32 %v812_v55 }
 0x351   : > { %v827_v59 = vpack.c.bf16 %v1119_v57, %v1119_v57  ;;  %v822_v60 = vsel %vm526_vm4, %v1119_v57, 0.0  ;;  %1122 = vrcp.f32 %v547_v58 }
 0x352   : > { %823 = vadd.xlane.f32.xlu2 %v822_v60 }
 0x353   : > { %1079 = vmatmul.msk.bf16.vlgmr.msra.gmra.mxu3 %vm526_vm4, %v827_v59  ;;  %v550_v61 = vpop.xlane.xlu1 %549 }
 0x354   : > { %1124 = vrcp.f32 %v550_v61 }
 0x356   : > { %v1121_v62 = vpop.eup %1120 }
 0x357   : > { %v826_v63 = vpack.c.bf16 %v1121_v62, %v1121_v62  ;;  %v819_v0 = vsel %vm526_vm4, %v1121_v62, 0.0  ;;  %v1123_v1 = vpop.eup %1122 }
 0x358   : > { %820 = vadd.xlane.f32.xlu0 %v819_v0  ;;  %v618_v2 = vmul.f32 %v1123_v1, %v1310_v39 }
 0x359   : > { %1078 = vmatmul.msk.bf16.vlgmr.msra.gmra.mxu2 %vm526_vm4, %v826_v63 }
 0x35a   : > { %v1125_v11 = vpop.eup %1124 }
 0x35b   : > { %v619_v3 = vmul.f32 %v1125_v11, %v1330_v56  ;;  %v553_v5 = vpop.xlane.xlu1 %552 }
 0x35c   : > { %1126 = vrcp.f32 %v553_v5 }
 0x35d   : > { %v621_v4 = vpack.c.bf16 %v619_v3, %v618_v2 }
 0x35f   : > { %1083 = vmatmul.msk.bf16.vlgmr.msra.gmra.mxu1 %vm460_vm2, %v621_v4 }
 0x362   : > { %v1127_v6 = vpop.eup %1126 }
 0x363   : > { %v620_v7 = vmul.f32 %v1127_v6, %v1321_v45 }
 0x365   : > { %v622_v8 = vpack.c.bf16 %v620_v7, %v620_v7 }
 0x36f   : > { %1084 = vmatmul.msk.bf16.gmra.mxu1 %vm460_vm2, %v622_v8 }
 0x3bb   : > { %v818_v13 = vpop.xlane.xlu2 %817 }
 0x3bc   : > { %1128 = vrcp.f32 %v818_v13 }
 0x3c2   : > { %v1129_v15 = vpop.eup %1128 }
 0x3c5   : > { %v824_v22 = vpop.xlane.xlu2 %823 }
 0x3c6   : > { %v843_v39 = vpop.f32.mrf.mxu1 }
 0x3c7   : > { %v888_v18 = vmul.f32 %v1129_v15, %v843_v39 }
 0x3cb   : > { %v821_v12 = vpop.xlane.xlu0 %820 }
 0x3cc   : > { %1130 = vrcp.f32 %v821_v12 }
 0x3cd   : > { %1132 = vrcp.f32 %v824_v22 }
 0x3ce   : > { %v845_v56 = vpop.f32.mrf.mxu1 }
 0x3d2   : > { %v1131_v16 = vpop.eup %1130 }
 0x3d3   : > { %v1133_v25 = vpop.eup %1132 }
 0x3d6   : > { %v881_v14 = vpop.f32.mrf.mxu3 }
 0x3d7   : > { %v890_v26 = vmul.f32 %v1133_v25, %v881_v14 }
 0x3d9   : > { %v892_v28 = vpack.c.bf16 %v890_v26, %v890_v26 }
 0x3dc   : > { %v862_v45 = vpop.f32.mrf.mxu2  ;;  %v941_v17 = vpop.f32.mrf.mxu1 }
 0x3dd   : > { %v889_v19 = vmul.f32 %v1131_v16, %v862_v45 }
 0x3de   : > { %v883_v20 = vpop.f32.mrf.mxu3 }
 0x3df   : > { %v891_v21 = vpack.c.bf16 %v889_v19, %v888_v18 }
 0x3e1   : > { %1081 = vmatmul.msk.bf16.vlgmr.msra.gmra.mxu0 %vm460_vm2, %v891_v21 }
 0x3e4   : > { %v864_v23 = vpop.f32.mrf.mxu2  ;;  %v943_v24 = vpop.f32.mrf.mxu1 }
 0x3ec   : > { %v946_v27 = vpop.f32.mrf.mxu1 }
 0x3f1   : > { %1082 = vmatmul.msk.bf16.gmra.mxu0 %vm460_vm2, %v892_v28 }
 0x3f4   : > { %v948_v29 = vpop.f32.mrf.mxu1 }
 0x45e   : > { %v914_v31 = vpop.f32.mrf.mxu0 }
 0x45f   : > { %v942_v33 = vadd.f32 %v941_v17, %v914_v31 }
 0x461   : > { %v954_v34 = vadd.f32 %v1109_v30, %v942_v33 }
 0x463   : > { %957 = vst.msk [vmem:[%s334_s24] sm:$0xff] %vm358_vm1, %v954_v34 }
 0x466   : > { %v916_v36 = vpop.f32.mrf.mxu0 }
 0x467   : > { %v944_v37 = vadd.f32 %v943_v24, %v916_v36 }
 0x469   : > { %v955_v38 = vadd.f32 %v1109_v30, %v944_v37 }
 0x46b   : > { %958 = vst.msk [vmem:[%s334_s24 + $0x8] sm:$0xff] %vm358_vm1, %v955_v38 }
 0x46e   : > { %v919_v40 = vpop.f32.mrf.mxu0 }
 0x46f   : > { %v947_v41 = vadd.f32 %v946_v27, %v919_v40 }
 0x471   : > { %v956_v46 = vadd.f32 %v1109_v30, %v947_v41 }
 0x473   : > { %959 = vst.msk [vmem:[%s334_s24 + $0x10] sm:$0xff] %vm358_vm1, %v956_v46 }
 0x476   : > { %v921_v42 = vpop.f32.mrf.mxu0 }
 0x477 PF: > { %s19_s30 = sadd.s32 1, %s1140_s30  }
 0x478   : > { %p16_p4 = scmp.ge.s32.totalorder %s19_s30, 4  }
 0x47a   :  { %18 = sbr.rel (!%p16_p4) target bundleno = 1 (0x1), region = 93 }

</bundles_post_ra>
